<compile_context>
chip_gen: v5e
topology: v5e:2x2
jax: 0.10.0
libtpu: 0.0.40
codegen_flags: <defaults>
</compile_context>

<pallas_src>
import functools

import jax
import jax.numpy as jnp
import numpy as np
from jax.experimental import pallas as pl
from jax.experimental.pallas import tpu as pltpu


def _round_up(v, m):
    return ((v + m - 1) // m) * m


# ----------------------------------------------------------------------------
# Pallas kernel: one grid step per row tile of the flattened spatial dim.
#   patches_ref : [TM, Kpad]        bf16  (im2col rows, K zero-padded to 128n)
#   w_ref       : [Kpad, Pe*Cpad]   bf16  (BN + path weight folded, lane-padded,
#                                          paths grouped in pairs)
#   b_ref       : [1, Pe*Cpad]      f32   (folded bias, zero-padded)
#   out_ref     : [TM, Cpad]        bf16  (lane-dense; wrapper slices to Cout)
# ----------------------------------------------------------------------------
def _fractal_kernel(patches_ref, w_ref, b_ref, out_ref, *, n_groups, gw, cpad):
    x = patches_ref[...]                                    # [TM, Kpad] bf16
    acc = jnp.zeros((x.shape[0], cpad), jnp.float32)
    for g in range(n_groups):                               # static unroll over path groups
        lo = g * gw * cpad
        hi = lo + gw * cpad
        # One MXU matmul per group (gw paths -> gw*cpad output lanes), f32 acc.
        z = jnp.dot(x, w_ref[:, lo:hi],
                    preferred_element_type=jnp.float32)     # [TM, gw*cpad]
        z = jnp.maximum(z + b_ref[:, lo:hi], 0.0)           # bias + ReLU per path (f32)
        # Fractal weighted average == plain sum (path weights folded, all > 0).
        # Static 128-aligned lane slices -> cheap VPU adds, no relayout; padded
        # zero-weight / zero-bias paths contribute relu(0) = 0.
        for j in range(gw):
            acc = acc + z[:, j * cpad:(j + 1) * cpad]
    out_ref[...] = acc.astype(out_ref.dtype)                 # bf16 lane-dense store


# ----------------------------------------------------------------------------
# Wrapper: BN + path-weight folding, bf16 im2col, layout plumbing, pallas_call.
# ----------------------------------------------------------------------------
def fractal_block_forward(x_nchw, conv_w, bn_gamma, bn_beta, bn_mean, bn_var,
                          path_w, eps=1e-5, tile_rows=1024,
                          vmem_limit_bytes=48 * 1024 * 1024):
    """x_nchw: [N, Cin, H, W].  conv_w: [P, Cout, Cin, 3, 3] (OIHW).

    Returns NCHW bf16 output (eval-mode FractalBlock forward).
    """
    P, Cout, Cin, KH, KW = conv_w.shape
    assert (KH, KW) == (3, 3)
    N, _, H, W = x_nchw.shape

    # Path weights must be strictly positive for the ReLU folding to be valid
    # (powers of 1/3 for this module).  Skip the check if path_w is a tracer.
    try:
        pw_min = float(np.min(np.asarray(path_w)))
    except Exception:
        pw_min = None  # under jit tracing; cannot concretize
    if pw_min is not None:
        assert pw_min > 0.0, "path weights must be > 0 for ReLU folding"

    # Fold eval-mode BatchNorm AND the fractal path weight into scale / bias.
    s = bn_gamma.astype(jnp.float32) / jnp.sqrt(bn_var.astype(jnp.float32) + eps)
    b = bn_beta.astype(jnp.float32) - bn_mean.astype(jnp.float32) * s   # [P, Cout]
    pw = path_w.astype(jnp.float32)[:, None]                            # [P, 1]
    s = s * pw
    b = b * pw
    w_folded = conv_w.astype(jnp.float32) * s[:, :, None, None, None]

    # Padded dims: lane dim -> 128, contraction dim -> 128, paths -> pair groups.
    Cpad = _round_up(Cout, 128)
    Kdim = 9 * Cin
    Kpad = _round_up(Kdim, 128)
    gw = 2 if Cpad == 128 else 1          # pair paths to fill the 256-wide MXU
    Pe = _round_up(P, gw)                 # pad to a whole number of groups
    n_groups = Pe // gw

    # Pack all taps and all paths into one [Kpad, Pe*Cpad] bf16 matrix.
    w_all = jnp.transpose(w_folded, (3, 4, 2, 0, 1))          # [3,3,Cin,P,Cout]
    w_all = w_all.reshape(Kdim, P, Cout)
    w_all = jnp.pad(w_all, ((0, Kpad - Kdim), (0, Pe - P), (0, Cpad - Cout)))
    w_all = w_all.reshape(Kpad, Pe * Cpad).astype(jnp.bfloat16)
    b_all = jnp.pad(b, ((0, Pe - P), (0, Cpad - Cout)))
    b_all = b_all.reshape(1, Pe * Cpad).astype(jnp.float32)

    # NCHW -> NHWC, cast bf16 FIRST (halves wrapper HBM traffic), pad=1, im2col.
    x = jnp.transpose(x_nchw, (0, 2, 3, 1)).astype(jnp.bfloat16)
    x_pad = jnp.pad(x, ((0, 0), (1, 1), (1, 1), (0, 0)))
    taps = [x_pad[:, dy:dy + H, dx:dx + W, :]
            for dy in range(3) for dx in range(3)]
    patches = jnp.stack(taps, axis=3).reshape(N * H * W, Kdim)

    # Row tiling: TM multiple of 16 (bf16 sublane pack), at least 2 grid steps
    # so a 2-TC chip (v7x) can split the "parallel" axis.
    rows = N * H * W
    tile_rows = _round_up(max(int(tile_rows), 16), 16)
    TM = min(tile_rows, _round_up(pl.cdiv(rows, 2), 16))
    TM = max(TM, 16)
    num_tiles = pl.cdiv(rows, TM)
    rows_pad = num_tiles * TM
    patches = jnp.pad(patches, ((0, rows_pad - rows), (0, Kpad - Kdim)))

    kernel = functools.partial(_fractal_kernel,
                               n_groups=n_groups, gw=gw, cpad=Cpad)

    out = pl.pallas_call(
        kernel,
        out_shape=jax.ShapeDtypeStruct((rows_pad, Cpad), jnp.bfloat16),
        grid=(num_tiles,),
        in_specs=[
            pl.BlockSpec((TM, Kpad), lambda i: (i, 0)),
            pl.BlockSpec((Kpad, Pe * Cpad), lambda i: (0, 0)),
            pl.BlockSpec((1, Pe * Cpad), lambda i: (0, 0)),
        ],
        out_specs=pl.BlockSpec((TM, Cpad), lambda i: (i, 0)),
        compiler_params=pltpu.CompilerParams(
            dimension_semantics=("parallel",),
            # 48 MiB leaves headroom on v7x (64 MiB physical); can be raised to
            # 64-96 MiB on v5e/v6e (128 MiB physical) for larger row tiles.
            vmem_limit_bytes=vmem_limit_bytes),
    )(patches, w_all, b_all)

    out = out[:rows, :Cout].reshape(N, H, W, Cout)
    return jnp.transpose(out, (0, 3, 1, 2))                  # back to NCHW (bf16)


# ----------------------------------------------------------------------------
# Fractal tree helpers + pure-JAX reference (eval-mode PyTorch semantics).
# ----------------------------------------------------------------------------
def path_weights(depth, w=1.0):
    """Preorder (local, branch1-subtree, branch2-subtree) path weights."""
    if depth == 1:
        return [w]
    return ([w / 3.0]
            + path_weights(depth - 1, w / 3.0)
            + path_weights(depth - 1, w / 3.0))


def reference_forward(x_nchw, conv_w, gamma, beta, mean, var, depth, eps=1e-5):
    counter = [0]

    def conv_block(x, i):
        y = jax.lax.conv_general_dilated(
            x, conv_w[i], window_strides=(1, 1), padding="SAME",
            dimension_numbers=("NCHW", "OIHW", "NCHW"))
        y = (y - mean[i][None, :, None, None]) / jnp.sqrt(
            var[i][None, :, None, None] + eps)
        y = y * gamma[i][None, :, None, None] + beta[i][None, :, None, None]
        return jnp.maximum(y, 0.0)

    def rec(x, d):
        i = counter[0]
        counter[0] += 1
        local = conv_block(x, i)
        if d == 1:
            return local
        return (local + rec(x, d - 1) + rec(x, d - 1)) / 3.0

    return rec(x_nchw, depth)


if __name__ == "__main__":
    key = jax.random.PRNGKey(0)
    N, Cin, H, W = 2, 4, 16, 16
    Cout, depth = 8, 2
    P = 2 ** depth - 1  # number of ConvBlocks in the fractal tree

    k = jax.random.split(key, 6)
    x = jax.random.normal(k[0], (N, Cin, H, W), jnp.float32)
    conv_w = jax.random.normal(k[1], (P, Cout, Cin, 3, 3), jnp.float32) \
        * (1.0 / np.sqrt(Cin * 9))
    gamma = 1.0 + 0.1 * jax.random.normal(k[2], (P, Cout), jnp.float32)
    beta = 0.1 * jax.random.normal(k[3], (P, Cout), jnp.float32)
    mean = 0.1 * jax.random.normal(k[4], (P, Cout), jnp.float32)
    var = 0.5 + jax.random.uniform(k[5], (P, Cout), jnp.float32)
    pw = jnp.array(path_weights(depth), jnp.float32)

    # tile_rows=128 so the toy shape (rows = 2*16*16 = 512) exercises a
    # multi-step parallel grid; real workloads would use 512-2048.
    out = fractal_block_forward(x, conv_w, gamma, beta, mean, var, pw,
                                tile_rows=128)
    out = jax.block_until_ready(out)

    ref = reference_forward(x, conv_w, gamma, beta, mean, var, depth)
    np.testing.assert_allclose(np.asarray(out.astype(jnp.float32)),
                               np.asarray(ref), rtol=3e-2, atol=3e-2)
    print("KERNEL_OK")
</pallas_src>

<mosaic_0001>
module attributes {stable_mosaic.version = 11 : i64} {
  func.func @_fractal_kernel(%arg0: i32, %arg1: memref<128x128xbf16, #tpu.memory_space<vmem>>, %arg2: memref<128x512xbf16, #tpu.memory_space<vmem>>, %arg3: memref<1x512xf32, #tpu.memory_space<vmem>>, %arg4: memref<128x128xbf16, #tpu.memory_space<vmem>>) attributes {dimension_semantics = [#tpu.dimension_semantics<parallel>], iteration_bounds = array<i64: 4>, scalar_prefetch = 0 : i64, scratch_operands = 0 : i64, tpu.core_type = #tpu.core_type<tc>, window_params = [{transform_indices = @transform_0, window_bounds = array<i64: 128, 128>}, {pipeline_mode = #tpu.pipeline_mode<synchronous>, transform_indices = @transform_1, window_bounds = array<i64: 128, 512>}, {pipeline_mode = #tpu.pipeline_mode<synchronous>, transform_indices = @transform_2, window_bounds = array<i64: 1, 512>}, {transform_indices = @transform_3, window_bounds = array<i64: 128, 128>}]} {
    %c0 = arith.constant 0 : index
    %c0_0 = arith.constant 0 : index
    %0 = vector.load %arg1[%c0, %c0_0] : memref<128x128xbf16, #tpu.memory_space<vmem>>, vector<128x128xbf16>
    %cst = arith.constant 0.000000e+00 : f32
    %1 = vector.broadcast %cst : f32 to vector<128x128xf32>
    %c0_1 = arith.constant 0 : index
    %c0_2 = arith.constant 0 : index
    %2 = vector.load %arg2[%c0_1, %c0_2] : memref<128x512xbf16, #tpu.memory_space<vmem>>, vector<128x256xbf16>
    %cst_3 = arith.constant dense<0.000000e+00> : vector<128x256xf32>
    %3 = tpu.matmul %0, %2, %cst_3 {dimension_numbers = #tpu.dot_dimension_numbers<[1], [0], [0], [1], [0, 0, 1, 1], [], []>} : vector<128x128xbf16>, vector<128x256xbf16>, vector<128x256xf32> -> vector<128x256xf32>
    %c0_4 = arith.constant 0 : index
    %c0_5 = arith.constant 0 : index
    %4 = vector.load %arg3[%c0_4, %c0_5] : memref<1x512xf32, #tpu.memory_space<vmem>>, vector<1x256xf32>
    %5 = vector.broadcast %4 : vector<1x256xf32> to vector<128x256xf32>
    %6 = arith.addf %3, %5 : vector<128x256xf32>
    %cst_6 = arith.constant 0.000000e+00 : f32
    %7 = vector.broadcast %cst_6 : f32 to vector<128x256xf32>
    %8 = arith.maximumf %6, %7 : vector<128x256xf32>
    %9 = vector.extract_strided_slice %8 {offsets = [0, 0], sizes = [128, 128], strides = [1, 1]} : vector<128x256xf32> to vector<128x128xf32>
    %10 = arith.addf %1, %9 : vector<128x128xf32>
    %11 = vector.extract_strided_slice %8 {offsets = [0, 128], sizes = [128, 128], strides = [1, 1]} : vector<128x256xf32> to vector<128x128xf32>
    %12 = arith.addf %10, %11 : vector<128x128xf32>
    %c0_7 = arith.constant 0 : index
    %c256 = arith.constant 256 : index
    %13 = vector.load %arg2[%c0_7, %c256] : memref<128x512xbf16, #tpu.memory_space<vmem>>, vector<128x256xbf16>
    %cst_8 = arith.constant dense<0.000000e+00> : vector<128x256xf32>
    %14 = tpu.matmul %0, %13, %cst_8 {dimension_numbers = #tpu.dot_dimension_numbers<[1], [0], [0], [1], [0, 0, 1, 1], [], []>} : vector<128x128xbf16>, vector<128x256xbf16>, vector<128x256xf32> -> vector<128x256xf32>
    %c0_9 = arith.constant 0 : index
    %c256_10 = arith.constant 256 : index
    %15 = vector.load %arg3[%c0_9, %c256_10] : memref<1x512xf32, #tpu.memory_space<vmem>>, vector<1x256xf32>
    %16 = vector.broadcast %15 : vector<1x256xf32> to vector<128x256xf32>
    %17 = arith.addf %14, %16 : vector<128x256xf32>
    %cst_11 = arith.constant 0.000000e+00 : f32
    %18 = vector.broadcast %cst_11 : f32 to vector<128x256xf32>
    %19 = arith.maximumf %17, %18 : vector<128x256xf32>
    %20 = vector.extract_strided_slice %19 {offsets = [0, 0], sizes = [128, 128], strides = [1, 1]} : vector<128x256xf32> to vector<128x128xf32>
    %21 = arith.addf %12, %20 : vector<128x128xf32>
    %22 = vector.extract_strided_slice %19 {offsets = [0, 128], sizes = [128, 128], strides = [1, 1]} : vector<128x256xf32> to vector<128x128xf32>
    %23 = arith.addf %21, %22 : vector<128x128xf32>
    %24 = arith.truncf %23 : vector<128x128xf32> to vector<128x128xbf16>
    %c0_12 = arith.constant 0 : index
    %c0_13 = arith.constant 0 : index
    %25 = vector.load %arg4[%c0_12, %c0_13] : memref<128x128xbf16, #tpu.memory_space<vmem>>, vector<128x128xbf16>
    tpu.vector_store %arg4[%c0_12, %c0_13], %24 {strides = array<i32>} : memref<128x128xbf16, #tpu.memory_space<vmem>>, vector<128x128xbf16>,
    return
  }
  func.func @transform_0(%arg0: i32) -> (i32, i32) {
    %c0_i32 = arith.constant 0 : i32
    %c0_i32_0 = arith.constant 0 : i32
    return %arg0, %c0_i32 : i32, i32
  }
  func.func @transform_1(%arg0: i32) -> (i32, i32) {
    %c0_i32 = arith.constant 0 : i32
    %c0_i32_0 = arith.constant 0 : i32
    %c0_i32_1 = arith.constant 0 : i32
    return %c0_i32, %c0_i32_0 : i32, i32
  }
  func.func @transform_2(%arg0: i32) -> (i32, i32) {
    %c0_i32 = arith.constant 0 : i32
    %c0_i32_0 = arith.constant 0 : i32
    %c0_i32_1 = arith.constant 0 : i32
    return %c0_i32, %c0_i32_0 : i32, i32
  }
  func.func @transform_3(%arg0: i32) -> (i32, i32) {
    %c0_i32 = arith.constant 0 : i32
    %c0_i32_0 = arith.constant 0 : i32
    return %arg0, %c0_i32 : i32, i32
  }
}

</mosaic_0001>

<bundles_post_ra>
// kernel: tpu_custom_call.1
= control target key start
LH: loop header
LB: loop body
LE: loop exit
PB: predicated region body
PF: predicated region fallthrough
CT: control target
= control target key end

     0   :  { %8 = vsyncpa [#allocation3], 0  ;;  %s1722_s0 = inlined_call_operand.hbm [shape: bf16[512,128], index: 0, kind: input, shape index: {}]   ;;  %s1723_s1 = inlined_call_operand.hbm [shape: bf16[128,512], index: 1, kind: input, shape index: {}]   ;;  %s1724_s2 = inlined_call_operand.hbm [shape: f32[1,512], index: 2, kind: input, shape index: {}]   ;;  %s1725_s3 = inlined_call_operand.hbm [shape: bf16[512,128], index: 3, kind: output, shape index: {}]  }
   0x1   :  { %10 = vsyncpa [#allocation3 + $0x1], 0 }
   0x2   :  { %11 = vsyncpa [#allocation6], 0 }
   0x3   :  { %12 = vsyncpa [#allocation4], 0 }
   0x4   :  { %14 = vsyncpa [#allocation4 + $0x1], 0  ;;  %s1486_s12 = smov 0   ;;  %s1488_s13 = smov 0  }
   0x5   :  { %s1490_s14 = smov 0   ;;  %s1492_s15 = smov 0  }
   0x6 LB: > { %s1507_s16 = sadd.s32 4294967295, %s1456_s15   ;;  %s956_s17 = sadd.s32 4294967294, %s1456_s15   ;;  %s1456_s15 = sphi %s1492_s15, %s1734_s15   ;;  %s1452_s14 = sphi %s1490_s14, %s1733_s14   ;;  %s1448_s13 = sphi %s1488_s13, %s1732_s13   ;;  %s1444_s12 = sphi %s1486_s12, %s1731_s12  }
   0x7   : > { %p40_p0 = scmp.ne.s32.totalorder %s1448_s13, %s1444_s12  ;;  %p41_p1 = scmp.eq.s32.totalorder %s1507_s16, 0 }
   0x8   : > { %p106_p2 = scmp.eq.s32.totalorder %s1507_s16, 3  ;;  %p112_p3 = scmp.eq.s32.totalorder %s956_s17, 3 }
   0x9   : > { %p1516_p4 = por %p41_p1, %p40_p0  ;;  %p957_p5 = scmp.ge.s32.totalorder %s1456_s15, 1 }
   0xa   : > { %p1521_p6 = por %p112_p3, %p40_p0  ;;  %p119_p7 = scmp.lt.s32.totalorder %s1456_s15, 5 }
   0xb   : > { %s130_s22 = sshll.u32 %s1723_s1, 4  ;;  %s1458_s24 = smov [#allocation5]   ;;  %s131_s22 = int_to_ptr.hbm [resolvable:$true] %s130_s22 }
   0xc   : > { %p1529_p8 = pnand %p957_p5, %p119_p7  ;;  %s132_s25 = sshll.u32 %s1458_s24, 4  ;;  %s133_s25 = int_to_ptr.vmem [resolvable:$true] %s132_s25 }
   0xd   : > { %s145_s28 = sshll.u32 %s1724_s2, 4  ;;  %s1459_s29 = smov 256   ;;  %s146_s28 = int_to_ptr.hbm [resolvable:$true] %s145_s28 }
   0xe   : > { %p1235_p9 = pneg %p1529_p8  ;;  %s1460_s30 = smov 16  }
   0xf   : > { %s1461_s4 = smov [#allocation7]   ;;  %s1541_s6 = sadd.s32 1, %s1456_s15  }
  0x10   : > { %p1236_p10 = pnand %p1235_p9, %p41_p1  ;;  %s147_s5 = sshll.u32 %s1461_s4, 4  ;;  %s148_s5 = int_to_ptr.vmem [resolvable:$true] %s147_s5 }
  0x11   : > { %s27_s7 = sadd.s32 1, %s1452_s14  ;;  %s24_s8 = ssub.s32 %s1456_s15, %s1541_s6 }
  0x12   : > { %1238 = dma.hbm_to_vmem [thread:$0]  (!%p1236_p10), %s131_s22, 4096, %s133_s25, [#allocation6], %s1459_s29, %s1459_s29, %s1460_s30  }
  0x13   : > { %1241 = dma.hbm_to_vmem [thread:$0]  (!%p1236_p10), %s146_s28, 64, %s148_s5, [#allocation6]  }
  0x14   : > { %p34_p11 = scmp.ne.s32.totalorder %s1452_s14, %s1448_s13  ;;  %p25_p12 = scmp.eq.s32.totalorder %s24_s8, 0 }
  0x15   : > { %p35_p13 = scmp.eq.s32.totalorder %s1456_s15, 0  ;;  %p1252_p3 = scmp.lt.s32.totalorder %s1456_s15, 4 }
  0x16   : > { %p1551_p0 = por %p106_p2, %p34_p11  ;;  %s158_s11 = sand.u32 1, %s1452_s14  }
  0x17   : > { %s1557_s10 = scalar_select %p25_p12, %s1452_s14, %s27_s7  }
  0x18   : > { %p36_p5 = por %p35_p13, %p34_p11  ;;  %s961_s17 = sshll.u32 %s158_s11, 6 }
  0x19   : > { %s1134_s20 = sshll.u32 %s1456_s15, 6  ;;  %s162_s25 = scalar_lea.vmem [#allocation2], %s961_s17 }
  0x1a   : > { %s167_s24 = scalar_lea.hbm %s1722_s0, %s1134_s20  ;;  %s170_s26 = sshll.u32 %s162_s25, 4  ;;  %s171_s26 = int_to_ptr.vmem [resolvable:$true] %s170_s26 }
  0x1b   : > { %s168_s27 = sshll.u32 %s167_s24, 4  ;;  %p1564_p2 = pnand %p1252_p3, %p36_p5  ;;  %s169_s27 = int_to_ptr.hbm [resolvable:$true] %s168_s27 }
  0x1c   : > { %s159_s29 = scalar_lea.sflag [#allocation3], %s158_s11  ;;  %s1356_s30 = sshra.s32 %s169_s27, 4  ;;  %s1357_s30 = int_to_ptr.hbm [resolvable:$true] %s1356_s30 }
  0x1d   : > { %s1358_s4 = scalar_lea.hbm %s1357_s30, 64  ;;  %p1360_p9 = pneg %p1564_p2 }
  0x1e   : > { %p1359_p7 = scmp.ne.s32.totalorder %s1357_s30, %s1358_s4  ;;  %s1363_s8 = scalar_lea.hbm %s1722_s0, 256 }
  0x1f   : > { %p1364_p12 = scmp.lt.s32.totalorder %s1357_s30, %s1722_s0  ;;  %p1365_p13 = scmp.lt.s32.totalorder %s1363_s8, %s1358_s4 }
  0x20   : > { %p1361_p10 = pnand %p1360_p9, %p1359_p7 }
  0x21   : > { %p1366_p3 = por %p1365_p13, %p1364_p12 }
  0x22   : > { %p1362_p11 = pneg %p1361_p10 }
  0x24   : > { %p1367_p5 = pnand %p1366_p3, %p1362_p11 }
  0x26   : > { %1370 = shalt.err (!%p1367_p5)
}
  0x27   : > { %s1462_s11 = smov 64   ;;  %s1463_s21 = smov 4  }
  0x28   : > { %1245 = dma.hbm_to_vmem [thread:$0]  (!%p1564_p2), %s169_s27, 1024, %s171_s26, %s159_s29, %s1462_s11, %s1462_s11, %s1463_s21  }
  0x29   : > { %182 = sbr.rel (%p1529_p8) target bundleno = 351 (0x15f), region = 32  ;;  %s1581_s22 = sand.u32 (!%p1529_p8), 1, %s1448_s13  }
  0x2a   : > { %s965_s24 = sshll.u32 (!%p1529_p8), %s1581_s22, 6  ;;  %s185_s25 = scalar_lea.sflag (!%p1529_p8), [#allocation3], %s1581_s22 }
  0x2b   : > { %s1587_s30 = scalar_lea.vmem (!%p1529_p8), [#allocation2], %s965_s24 }
  0x2e   : > { %1431 = dma.done.wait (%p1516_p4), %s185_s25, 1024  }
  0x2f   : > { %1433 = vsyncadd (%p1516_p4), %s185_s25, 4294966272 }
  0x30   : > { %1435 = dma.done.wait (%p41_p1), [#allocation6], 4160  }
  0x31   : > { %1437 = vsyncadd (%p41_p1), [#allocation6], 4294963136  ;;  %v1059_v0 = vld [vmem:[#allocation5 + $0xe0] sm:$0xf]  ;;  %v1158_v1 = vld [vmem:[#allocation5 + $0xec] sm:$0xf0] }
  0x32   : > { %v1157_v2 = vld [vmem:[#allocation5 + $0xe4] sm:$0xf]  ;;  %v1060_v3 = vor.u32 %v1158_v1, %v1059_v0  ;;  %v1061_v4 = vld [vmem:[#allocation5 + $0xf0] sm:$0xf0]  ;;  %v1123_v5 = vld [vmem:[#allocation5 + $0xe8] sm:$0xf] }
  0x33   : > { %v1174_v6 = vld [vmem:[#allocation5 + $0xf4] sm:$0xf0]  ;;  %v1064_v7 = vor.u32 %v1157_v2, %v1061_v4  ;;  %v1173_v9 = vld [vmem:[#allocation5 + $0xec] sm:$0xf]  ;;  %v1125_v10 = vld [vmem:[#allocation5 + $0xf8] sm:$0xf0] }
  0x34   : > { %v1124_v8 = vor.u32 %v1174_v6, %v1123_v5  ;;  %v1051_v11 = vld [vmem:[#allocation5 + $0xc0] sm:$0xf]  ;;  %390 = vmatpush.bf16.msra.mxu0 %v1060_v3  ;;  %v1128_v12 = vor.u32 %v1173_v9, %v1125_v10  ;;  %v1156_v13 = vld [vmem:[#allocation5 + $0xcc] sm:$0xf0]  ;;  %v1155_v14 = vld [vmem:[#allocation5 + $0xc4] sm:$0xf] }
  0x35   : > { %v1053_v15 = vld [vmem:[#allocation5 + $0xd0] sm:$0xf0]  ;;  %439 = vmatpush.bf16.msra.mxu1 %v1064_v7  ;;  %v1052_v16 = vor.u32 %v1156_v13, %v1051_v11  ;;  %v1115_v18 = vld [vmem:[#allocation5 + $0xc8] sm:$0xf]  ;;  %v1172_v19 = vld [vmem:[#allocation5 + $0xd4] sm:$0xf0] }
  0x36   : > { %654 = vmatpush.bf16.msra.mxu2 %v1124_v8  ;;  %v1056_v17 = vor.u32 %v1155_v14, %v1053_v15  ;;  %v1171_v20 = vld [vmem:[#allocation5 + $0xcc] sm:$0xf]  ;;  %703 = vmatpush.bf16.msra.mxu3 %v1128_v12  ;;  %v1116_v21 = vor.u32 %v1172_v19, %v1115_v18  ;;  %v1117_v22 = vld [vmem:[#allocation5 + $0xd8] sm:$0xf0]  ;;  %v1043_v23 = vld [vmem:[#allocation5 + $0xa0] sm:$0xf] }
  0x37   : > { %v1154_v24 = vld [vmem:[#allocation5 + $0xac] sm:$0xf0]  ;;  %v1120_v25 = vor.u32 %v1171_v20, %v1117_v22  ;;  %v1153_v26 = vld [vmem:[#allocation5 + $0xa4] sm:$0xf]  ;;  %v1045_v27 = vld [vmem:[#allocation5 + $0xb0] sm:$0xf0] }
  0x38   : > { %v1107_v28 = vld [vmem:[#allocation5 + $0xa8] sm:$0xf]  ;;  %391 = vmatpush.bf16.msra.mxu0 %v1052_v16  ;;  %v1044_v29 = vor.u32 %v1154_v24, %v1043_v23  ;;  %v1170_v30 = vld [vmem:[#allocation5 + $0xb4] sm:$0xf0]  ;;  %v1169_v31 = vld [vmem:[#allocation5 + $0xac] sm:$0xf]  ;;  %v1048_v33 = vor.u32 %v1153_v26, %v1045_v27 }
  0x39   : > { %v1109_v32 = vld [vmem:[#allocation5 + $0xb8] sm:$0xf0]  ;;  %440 = vmatpush.bf16.msra.mxu1 %v1056_v17  ;;  %v1108_v34 = vor.u32 %v1170_v30, %v1107_v28  ;;  %v1035_v35 = vld [vmem:[#allocation5 + $0x80] sm:$0xf]  ;;  %v1152_v36 = vld [vmem:[#allocation5 + $0x8c] sm:$0xf0] }
  0x3a   : > { %655 = vmatpush.bf16.msra.mxu2 %v1116_v21  ;;  %v1151_v37 = vld [vmem:[#allocation5 + $0x84] sm:$0xf]  ;;  %704 = vmatpush.bf16.msra.mxu3 %v1120_v25  ;;  %v1112_v38 = vor.u32 %v1169_v31, %v1109_v32  ;;  %v1037_v39 = vld [vmem:[#allocation5 + $0x90] sm:$0xf0]  ;;  %v1099_v40 = vld [vmem:[#allocation5 + $0x88] sm:$0xf]  ;;  %v1036_v44 = vor.u32 %v1152_v36, %v1035_v35 }
  0x3b   : > { %v1168_v41 = vld [vmem:[#allocation5 + $0x94] sm:$0xf0]  ;;  %v1167_v42 = vld [vmem:[#allocation5 + $0x8c] sm:$0xf]  ;;  %v1101_v43 = vld [vmem:[#allocation5 + $0x98] sm:$0xf0]  ;;  %v1040_v45 = vor.u32 %v1151_v37, %v1037_v39 }
  0x3c   : > { %392 = vmatpush.bf16.msra.mxu0 %v1044_v29  ;;  %v1100_v46 = vor.u32 %v1168_v41, %v1099_v40  ;;  %v1027_v47 = vld [vmem:[#allocation5 + $0x60] sm:$0xf]  ;;  %v1150_v48 = vld [vmem:[#allocation5 + $0x6c] sm:$0xf0]  ;;  %v1149_v49 = vld [vmem:[#allocation5 + $0x64] sm:$0xf]  ;;  %v1104_v50 = vor.u32 %v1167_v42, %v1101_v43 }
  0x3d   : > { %441 = vmatpush.bf16.msra.mxu1 %v1048_v33  ;;  %v1029_v51 = vld [vmem:[#allocation5 + $0x70] sm:$0xf0]  ;;  %v1091_v52 = vld [vmem:[#allocation5 + $0x68] sm:$0xf]  ;;  %v1166_v53 = vld [vmem:[#allocation5 + $0x74] sm:$0xf0]  ;;  %v1028_v56 = vor.u32 %v1150_v48, %v1027_v47 }
  0x3e   : > { %656 = vmatpush.bf16.msra.mxu2 %v1108_v34  ;;  %705 = vmatpush.bf16.msra.mxu3 %v1112_v38  ;;  %v1165_v54 = vld [vmem:[#allocation5 + $0x6c] sm:$0xf]  ;;  %v1093_v55 = vld [vmem:[#allocation5 + $0x78] sm:$0xf0]  ;;  %v1032_v57 = vor.u32 %v1149_v49, %v1029_v51  ;;  %v1092_v58 = vor.u32 %v1166_v53, %v1091_v52  ;;  %v1019_v59 = vld [vmem:[#allocation5 + $0x40] sm:$0xf] }
  0x3f   : > { %v1148_v60 = vld [vmem:[#allocation5 + $0x4c] sm:$0xf0]  ;;  %v1147_v61 = vld [vmem:[#allocation5 + $0x44] sm:$0xf]  ;;  %v1096_v62 = vor.u32 %v1165_v54, %v1093_v55  ;;  %v1021_v63 = vld [vmem:[#allocation5 + $0x50] sm:$0xf0] }
  0x40   : > { %393 = vmatpush.bf16.msra.mxu0 %v1036_v44  ;;  %v1083_v0 = vld [vmem:[#allocation5 + $0x48] sm:$0xf]  ;;  %v1164_v1 = vld [vmem:[#allocation5 + $0x54] sm:$0xf0]  ;;  %v1163_v2 = vld [vmem:[#allocation5 + $0x4c] sm:$0xf]  ;;  %v1020_v4 = vor.u32 %v1148_v60, %v1019_v59  ;;  %v1024_v5 = vor.u32 %v1147_v61, %v1021_v63 }
  0x41   : > { %442 = vmatpush.bf16.msra.mxu1 %v1040_v45  ;;  %v1085_v3 = vld [vmem:[#allocation5 + $0x58] sm:$0xf0]  ;;  %v1084_v6 = vor.u32 %v1164_v1, %v1083_v0  ;;  %v1011_v7 = vld [vmem:[#allocation5 + $0x20] sm:$0xf]  ;;  %v1146_v8 = vld [vmem:[#allocation5 + $0x2c] sm:$0xf0] }
  0x42   : > { %657 = vmatpush.bf16.msra.mxu2 %v1100_v46  ;;  %706 = vmatpush.bf16.msra.mxu3 %v1104_v50  ;;  %v1145_v9 = vld [vmem:[#allocation5 + $0x24] sm:$0xf]  ;;  %v1088_v10 = vor.u32 %v1163_v2, %v1085_v3  ;;  %v1013_v11 = vld [vmem:[#allocation5 + $0x30] sm:$0xf0]  ;;  %v1075_v12 = vld [vmem:[#allocation5 + $0x28] sm:$0xf]  ;;  %v1012_v16 = vor.u32 %v1146_v8, %v1011_v7 }
  0x43   : > { %v1162_v13 = vld [vmem:[#allocation5 + $0x34] sm:$0xf0]  ;;  %v1161_v14 = vld [vmem:[#allocation5 + $0x2c] sm:$0xf]  ;;  %v1077_v15 = vld [vmem:[#allocation5 + $0x38] sm:$0xf0]  ;;  %v1016_v17 = vor.u32 %v1145_v9, %v1013_v11 }
  0x44   : > { %394 = vmatpush.bf16.msra.mxu0 %v1028_v56  ;;  %v1076_v18 = vor.u32 %v1162_v13, %v1075_v12  ;;  %v1003_v19 = vld [vmem:[#allocation5] sm:$0xf]  ;;  %v1144_v20 = vld [vmem:[#allocation5 + $0xc] sm:$0xf0]  ;;  %v1143_v21 = vld [vmem:[#allocation5 + $0x4] sm:$0xf]  ;;  %v1080_v22 = vor.u32 %v1161_v14, %v1077_v15 }
  0x45   : > { %443 = vmatpush.bf16.msra.mxu1 %v1032_v57  ;;  %v1005_v23 = vld [vmem:[#allocation5 + $0x10] sm:$0xf0]  ;;  %v1067_v24 = vld [vmem:[#allocation5 + $0x8] sm:$0xf]  ;;  %v1160_v25 = vld [vmem:[#allocation5 + $0x14] sm:$0xf0]  ;;  %v1004_v28 = vor.u32 %v1144_v20, %v1003_v19 }
  0x46   : > { %658 = vmatpush.bf16.msra.mxu2 %v1092_v58  ;;  %707 = vmatpush.bf16.msra.mxu3 %v1096_v62  ;;  %v1159_v26 = vld [vmem:[#allocation5 + $0xc] sm:$0xf]  ;;  %v1069_v27 = vld [vmem:[#allocation5 + $0x18] sm:$0xf0]  ;;  %v1008_v29 = vor.u32 %v1143_v21, %v1005_v23  ;;  %v1068_v30 = vor.u32 %v1160_v25, %v1067_v24  ;;  %v1135_v32 = vld [vmem:[%s1587_s30] sm:$0xff]  ;;  %s1625_s18 = scalar_lea.vmem [#allocation8], %s965_s24 }
  0x47   : > { %v1072_v31 = vor.u32 %v1159_v26, %v1069_v27  ;;  %v1136_v33 = vld [vmem:[%s1587_s30 + $0x8] sm:$0xff]  ;;  %v1137_v34 = vld [vmem:[%s1587_s30 + $0x10] sm:$0xff]  ;;  %v1138_v35 = vld [vmem:[%s1587_s30 + $0x18] sm:$0xff]  ;;  %s1175_s23 = sshll.u32 %s1507_s16, 6  ;;  %s861_s16 = sshll.u32 %s1625_s18, 4  ;;  %s862_s16 = int_to_ptr.vmem [resolvable:$true] %s861_s16 }
  0x48   : > { %395 = vmatpush.bf16.msra.mxu0 %v1020_v4  ;;  %v1139_v36 = vld [vmem:[%s1587_s30 + $0x20] sm:$0xff]  ;;  %v1140_v37 = vld [vmem:[%s1587_s30 + $0x28] sm:$0xff]  ;;  %v1141_v38 = vld [vmem:[%s1587_s30 + $0x30] sm:$0xff]  ;;  %s860_s28 = scalar_lea.hbm %s1725_s3, %s1175_s23  ;;  %s849_s4 = scalar_lea.sflag [#allocation4], %s1581_s22 }
  0x49   : > { %444 = vmatpush.bf16.msra.mxu1 %v1024_v5  ;;  %v1142_v39 = vld [vmem:[%s1587_s30 + $0x38] sm:$0xff]  ;;  %v256_v40 = vld [vmem:[#allocation7] sm:$0x3]  ;;  %v568_v45 = vld [vmem:[#allocation7 + $0x2] sm:$0x3]  ;;  %s863_s29 = sshll.u32 %s860_s28, 4  ;;  %s864_s29 = int_to_ptr.hbm [resolvable:$true] %s863_s29 }
  0x4a   : > { %659 = vmatpush.bf16.msra.mxu2 %v1084_v6  ;;  %708 = vmatpush.bf16.msra.mxu3 %v1088_v10  ;;  %v1605_v42 = vperm.slane %v256_v40, 0  ;;  %v1607_v43 = vperm.slane %v256_v40, 1  ;;  %v1611_v48 = vperm.slane %v568_v45, 0  ;;  %v1614_v56 = vperm.slane %v568_v45, 1  ;;  %s1400_s5 = sshra.s32 %s864_s29, 4  ;;  %s1406_s20 = scalar_lea.hbm %s1725_s3, 256  ;;  %s1401_s5 = int_to_ptr.hbm [resolvable:$true] %s1400_s5 }
  0x4b   : > { %s1402_s7 = scalar_lea.hbm %s1401_s5, 64  ;;  %p1407_p2 = scmp.lt.s32.totalorder %s1401_s5, %s1725_s3 }
  0x4c   : > { %396 = vmatpush.bf16.msra.mxu0 %v1012_v16  ;;  %p1403_p1 = scmp.ne.s32.totalorder %s1401_s5, %s1402_s7  ;;  %p1408_p7 = scmp.lt.s32.totalorder %s1406_s20, %s1402_s7 }
  0x4d   : > { %445 = vmatpush.bf16.msra.mxu1 %v1016_v17 }
  0x4e   : > { %660 = vmatpush.bf16.msra.mxu2 %v1076_v18  ;;  %709 = vmatpush.bf16.msra.mxu3 %v1080_v22  ;;  %p1404_p4 = pnand %p1403_p1, %p1551_p0  ;;  %p1409_p9 = por %p1408_p7, %p1407_p2 }
  0x50   : > { %397 = vmatpush.bf16.msra.mxu0 %v1004_v28  ;;  %p1405_p8 = pneg %p1404_p4 }
  0x51   : > { %446 = vmatpush.bf16.msra.mxu1 %v1008_v29 }
  0x52   : > { %661 = vmatpush.bf16.msra.mxu2 %v1068_v30  ;;  %710 = vmatpush.bf16.msra.mxu3 %v1072_v31  ;;  %p1410_p10 = pnand %p1409_p9, %p1405_p8 }
  0x53   : > { %398 = vmatmul.bf16.vlgmr.msra.gmra.mxu0 %v1135_v32 }
  0x54   : > { %447 = vmatmul.bf16.vlgmr.msra.gmra.mxu1 %v1135_v32 }
  0x55   : > { %662 = vmatmul.bf16.vlgmr.msra.gmra.mxu2 %v1135_v32  ;;  %711 = vmatmul.bf16.vlgmr.msra.gmra.mxu3 %v1135_v32 }
  0x63   : > { %403 = vmatmul.bf16.gmra.mxu0 %v1136_v33 }
  0x64   : > { %452 = vmatmul.bf16.gmra.mxu1 %v1136_v33 }
  0x65   : > { %667 = vmatmul.bf16.gmra.mxu2 %v1136_v33  ;;  %716 = vmatmul.bf16.gmra.mxu3 %v1136_v33 }
  0x73   : > { %408 = vmatmul.bf16.gmra.mxu0 %v1137_v34 }
  0x74   : > { %457 = vmatmul.bf16.gmra.mxu1 %v1137_v34 }
  0x75   : > { %672 = vmatmul.bf16.gmra.mxu2 %v1137_v34  ;;  %721 = vmatmul.bf16.gmra.mxu3 %v1137_v34 }
  0x83   : > { %413 = vmatmul.bf16.gmra.mxu0 %v1138_v35 }
  0x84   : > { %462 = vmatmul.bf16.gmra.mxu1 %v1138_v35 }
  0x85   : > { %677 = vmatmul.bf16.gmra.mxu2 %v1138_v35  ;;  %726 = vmatmul.bf16.gmra.mxu3 %v1138_v35 }
  0x93   : > { %418 = vmatmul.bf16.gmra.mxu0 %v1139_v36 }
  0x94   : > { %467 = vmatmul.bf16.gmra.mxu1 %v1139_v36 }
  0x95   : > { %682 = vmatmul.bf16.gmra.mxu2 %v1139_v36  ;;  %731 = vmatmul.bf16.gmra.mxu3 %v1139_v36 }
  0xa3   : > { %423 = vmatmul.bf16.gmra.mxu0 %v1140_v37 }
  0xa4   : > { %472 = vmatmul.bf16.gmra.mxu1 %v1140_v37 }
  0xa5   : > { %687 = vmatmul.bf16.gmra.mxu2 %v1140_v37  ;;  %736 = vmatmul.bf16.gmra.mxu3 %v1140_v37 }
  0xb3   : > { %428 = vmatmul.bf16.gmra.mxu0 %v1141_v38 }
  0xb4   : > { %477 = vmatmul.bf16.gmra.mxu1 %v1141_v38 }
  0xb5   : > { %692 = vmatmul.bf16.gmra.mxu2 %v1141_v38  ;;  %741 = vmatmul.bf16.gmra.mxu3 %v1141_v38 }
  0xc3   : > { %433 = vmatmul.bf16.gmra.mxu0 %v1142_v39 }
  0xc4   : > { %482 = vmatmul.bf16.gmra.mxu1 %v1142_v39 }
  0xc5   : > { %697 = vmatmul.bf16.gmra.mxu2 %v1142_v39  ;;  %746 = vmatmul.bf16.gmra.mxu3 %v1142_v39 }
  0xd0   : > { %v399_v41 = vpop.f32.mrf.mxu0 }
  0xd1   : > { %v448_v44 = vpop.f32.mrf.mxu1  ;;  %v400_v46 = vadd.f32 %v399_v41, %v1605_v42 }
  0xd2   : > { %v449_v47 = vadd.f32 %v448_v44, %v1607_v43 }
  0xd3   : > { %v488_v52 = vmax.f32 %v400_v46, 0.0 }
  0xd4   : > { %v489_v53 = vmax.f32 %v449_v47, 0.0 }
  0xd6   : > { %v536_v59 = vadd.f32 %v489_v53, %v488_v52 }
  0xd8   : > { %v663_v49 = vpop.f32.mrf.mxu2  ;;  %v712_v50 = vpop.f32.mrf.mxu3 }
  0xd9   : > { %v401_v51 = vpop.f32.mrf.mxu0  ;;  %v450_v54 = vpop.f32.mrf.mxu1  ;;  %v664_v55 = vadd.f32 %v663_v49, %v1611_v48  ;;  %v713_v61 = vadd.f32 %v712_v50, %v1614_v56 }
  0xda   : > { %v402_v57 = vadd.f32 %v401_v51, %v1605_v42  ;;  %v451_v58 = vadd.f32 %v450_v54, %v1607_v43 }
  0xdb   : > { %v752_v60 = vmax.f32 %v664_v55, 0.0  ;;  %v753_v7 = vmax.f32 %v713_v61, 0.0 }
  0xdc   : > { %v490_v62 = vmax.f32 %v402_v57, 0.0  ;;  %v491_v63 = vmax.f32 %v451_v58, 0.0 }
  0xdd   : > { %v784_v6 = vadd.f32 %v752_v60, %v536_v59 }
  0xde   : > { %v537_v8 = vadd.f32 %v491_v63, %v490_v62 }
  0xdf   : > { %v800_v14 = vadd.f32 %v784_v6, %v753_v7 }
  0xe0   : > { %v665_v0 = vpop.f32.mrf.mxu2  ;;  %v714_v2 = vpop.f32.mrf.mxu3 }
  0xe1   : > { %v666_v1 = vadd.f32 %v665_v0, %v1611_v48  ;;  %v404_v3 = vpop.f32.mrf.mxu0  ;;  %v715_v4 = vadd.f32 %v714_v2, %v1614_v56  ;;  %v453_v5 = vpop.f32.mrf.mxu1 }
  0xe2   : > { %v405_v12 = vadd.f32 %v404_v3, %v1605_v42  ;;  %v454_v13 = vadd.f32 %v453_v5, %v1607_v43 }
  0xe3   : > { %v754_v9 = vmax.f32 %v666_v1, 0.0  ;;  %v755_v11 = vmax.f32 %v715_v4, 0.0 }
  0xe4   : > { %v492_v20 = vmax.f32 %v405_v12, 0.0  ;;  %v493_v21 = vmax.f32 %v454_v13, 0.0 }
  0xe5   : > { %v785_v10 = vadd.f32 %v754_v9, %v537_v8 }
  0xe6   : > { %v538_v26 = vadd.f32 %v493_v21, %v492_v20 }
  0xe7   : > { %v801_v15 = vadd.f32 %v785_v10, %v755_v11 }
  0xe8   : > { %v668_v16 = vpop.f32.mrf.mxu2  ;;  %v717_v18 = vpop.f32.mrf.mxu3 }
  0xe9   : > { %v1179_v17 = vpack.c.bf16 %v801_v15, %v800_v14  ;;  %v406_v19 = vpop.f32.mrf.mxu0  ;;  %v455_v22 = vpop.f32.mrf.mxu1  ;;  %v669_v23 = vadd.f32 %v668_v16, %v1611_v48  ;;  %v718_v28 = vadd.f32 %v717_v18, %v1614_v56 }
  0xea   : > { %v407_v24 = vadd.f32 %v406_v19, %v1605_v42  ;;  %v456_v25 = vadd.f32 %v455_v22, %v1607_v43 }
  0xeb   : > { %1180 = vst [vmem:[%s1625_s18] sm:$0xff] %v1179_v17   ;;  %v756_v27 = vmax.f32 %v669_v23, 0.0  ;;  %v757_v38 = vmax.f32 %v718_v28, 0.0 }
  0xec   : > { %v494_v29 = vmax.f32 %v407_v24, 0.0  ;;  %v495_v30 = vmax.f32 %v456_v25, 0.0 }
  0xed   : > { %v786_v37 = vadd.f32 %v756_v27, %v538_v26 }
  0xee   : > { %v539_v39 = vadd.f32 %v495_v30, %v494_v29 }
  0xef   : > { %v802_v47 = vadd.f32 %v786_v37, %v757_v38 }
  0xf0   : > { %v670_v31 = vpop.f32.mrf.mxu2  ;;  %v719_v33 = vpop.f32.mrf.mxu3 }
  0xf1   : > { %v671_v32 = vadd.f32 %v670_v31, %v1611_v48  ;;  %v409_v34 = vpop.f32.mrf.mxu0  ;;  %v720_v35 = vadd.f32 %v719_v33, %v1614_v56  ;;  %v458_v36 = vpop.f32.mrf.mxu1 }
  0xf2   : > { %v410_v45 = vadd.f32 %v409_v34, %v1605_v42  ;;  %v459_v46 = vadd.f32 %v458_v36, %v1607_v43 }
  0xf3   : > { %v758_v40 = vmax.f32 %v671_v32, 0.0  ;;  %v759_v44 = vmax.f32 %v720_v35, 0.0 }
  0xf4   : > { %v496_v54 = vmax.f32 %v410_v45, 0.0  ;;  %v497_v55 = vmax.f32 %v459_v46, 0.0 }
  0xf5   : > { %v787_v41 = vadd.f32 %v758_v40, %v539_v39 }
  0xf6   : > { %v540_v61 = vadd.f32 %v497_v55, %v496_v54 }
  0xf7   : > { %v803_v49 = vadd.f32 %v787_v41, %v759_v44 }
  0xf8   : > { %v673_v50 = vpop.f32.mrf.mxu2  ;;  %v722_v52 = vpop.f32.mrf.mxu3 }
  0xf9   : > { %v1184_v51 = vpack.c.bf16 %v803_v49, %v802_v47  ;;  %v411_v53 = vpop.f32.mrf.mxu0  ;;  %v460_v57 = vpop.f32.mrf.mxu1  ;;  %v674_v58 = vadd.f32 %v673_v50, %v1611_v48  ;;  %v723_v63 = vadd.f32 %v722_v52, %v1614_v56 }
  0xfa   : > { %v412_v59 = vadd.f32 %v411_v53, %v1605_v42  ;;  %v461_v60 = vadd.f32 %v460_v57, %v1607_v43 }
  0xfb   : > { %1216 = vst [vmem:[%s1625_s18 + $0x8] sm:$0xff] %v1184_v51   ;;  %v760_v62 = vmax.f32 %v674_v58, 0.0  ;;  %v761_v9 = vmax.f32 %v723_v63, 0.0 }
  0xfc   : > { %v498_v0 = vmax.f32 %v412_v59, 0.0  ;;  %v499_v1 = vmax.f32 %v461_v60, 0.0 }
  0xfd   : > { %v788_v8 = vadd.f32 %v760_v62, %v540_v61 }
  0xfe   : > { %v541_v10 = vadd.f32 %v499_v1, %v498_v0 }
  0xff   : > { %v804_v16 = vadd.f32 %v788_v8, %v761_v9 }
 0x100   : > { %v675_v2 = vpop.f32.mrf.mxu2  ;;  %v724_v4 = vpop.f32.mrf.mxu3 }
 0x101   : > { %v676_v3 = vadd.f32 %v675_v2, %v1611_v48  ;;  %v414_v5 = vpop.f32.mrf.mxu0  ;;  %v725_v6 = vadd.f32 %v724_v4, %v1614_v56  ;;  %v463_v7 = vpop.f32.mrf.mxu1 }
 0x102   : > { %v415_v14 = vadd.f32 %v414_v5, %v1605_v42  ;;  %v464_v15 = vadd.f32 %v463_v7, %v1607_v43 }
 0x103   : > { %v762_v11 = vmax.f32 %v676_v3, 0.0  ;;  %v763_v13 = vmax.f32 %v725_v6, 0.0 }
 0x104   : > { %v500_v22 = vmax.f32 %v415_v14, 0.0  ;;  %v501_v23 = vmax.f32 %v464_v15, 0.0 }
 0x105   : > { %v789_v12 = vadd.f32 %v762_v11, %v541_v10 }
 0x106   : > { %v542_v28 = vadd.f32 %v501_v23, %v500_v22 }
 0x107   : > { %v805_v17 = vadd.f32 %v789_v12, %v763_v13 }
 0x108   : > { %v678_v18 = vpop.f32.mrf.mxu2  ;;  %v727_v20 = vpop.f32.mrf.mxu3 }
 0x109   : > { %v1189_v19 = vpack.c.bf16 %v805_v17, %v804_v16  ;;  %v416_v21 = vpop.f32.mrf.mxu0  ;;  %v465_v24 = vpop.f32.mrf.mxu1  ;;  %v679_v25 = vadd.f32 %v678_v18, %v1611_v48  ;;  %v728_v30 = vadd.f32 %v727_v20, %v1614_v56 }
 0x10a   : > { %v417_v26 = vadd.f32 %v416_v21, %v1605_v42  ;;  %v466_v27 = vadd.f32 %v465_v24, %v1607_v43 }
 0x10b   : > { %1217 = vst [vmem:[%s1625_s18 + $0x10] sm:$0xff] %v1189_v19   ;;  %v764_v29 = vmax.f32 %v679_v25, 0.0  ;;  %v765_v40 = vmax.f32 %v728_v30, 0.0 }
 0x10c   : > { %v502_v31 = vmax.f32 %v417_v26, 0.0  ;;  %v503_v32 = vmax.f32 %v466_v27, 0.0 }
 0x10d   : > { %v790_v39 = vadd.f32 %v764_v29, %v542_v28 }
 0x10e   : > { %v543_v41 = vadd.f32 %v503_v32, %v502_v31 }
 0x10f   : > { %v806_v50 = vadd.f32 %v790_v39, %v765_v40 }
 0x110   : > { %v680_v33 = vpop.f32.mrf.mxu2  ;;  %v729_v35 = vpop.f32.mrf.mxu3 }
 0x111   : > { %v681_v34 = vadd.f32 %v680_v33, %v1611_v48  ;;  %v419_v36 = vpop.f32.mrf.mxu0  ;;  %v730_v37 = vadd.f32 %v729_v35, %v1614_v56  ;;  %v468_v38 = vpop.f32.mrf.mxu1 }
 0x112   : > { %v420_v47 = vadd.f32 %v419_v36, %v1605_v42  ;;  %v469_v49 = vadd.f32 %v468_v38, %v1607_v43 }
 0x113   : > { %v766_v44 = vmax.f32 %v681_v34, 0.0  ;;  %v767_v46 = vmax.f32 %v730_v37, 0.0 }
 0x114   : > { %v504_v57 = vmax.f32 %v420_v47, 0.0  ;;  %v505_v58 = vmax.f32 %v469_v49, 0.0 }
 0x115   : > { %v791_v45 = vadd.f32 %v766_v44, %v543_v41 }
 0x116   : > { %v544_v63 = vadd.f32 %v505_v58, %v504_v57 }
 0x117   : > { %v807_v51 = vadd.f32 %v791_v45, %v767_v46 }
 0x118   : > { %v683_v52 = vpop.f32.mrf.mxu2  ;;  %v732_v54 = vpop.f32.mrf.mxu3 }
 0x119   : > { %v1194_v53 = vpack.c.bf16 %v807_v51, %v806_v50  ;;  %v421_v55 = vpop.f32.mrf.mxu0  ;;  %v470_v59 = vpop.f32.mrf.mxu1  ;;  %v684_v60 = vadd.f32 %v683_v52, %v1611_v48  ;;  %v733_v1 = vadd.f32 %v732_v54, %v1614_v56 }
 0x11a   : > { %v422_v61 = vadd.f32 %v421_v55, %v1605_v42  ;;  %v471_v62 = vadd.f32 %v470_v59, %v1607_v43 }
 0x11b   : > { %1218 = vst [vmem:[%s1625_s18 + $0x18] sm:$0xff] %v1194_v53   ;;  %v768_v0 = vmax.f32 %v684_v60, 0.0  ;;  %v769_v11 = vmax.f32 %v733_v1, 0.0 }
 0x11c   : > { %v506_v2 = vmax.f32 %v422_v61, 0.0  ;;  %v507_v3 = vmax.f32 %v471_v62, 0.0 }
 0x11d   : > { %v792_v10 = vadd.f32 %v768_v0, %v544_v63 }
 0x11e   : > { %v545_v12 = vadd.f32 %v507_v3, %v506_v2 }
 0x11f   : > { %v808_v18 = vadd.f32 %v792_v10, %v769_v11 }
 0x120   : > { %v685_v4 = vpop.f32.mrf.mxu2  ;;  %v734_v6 = vpop.f32.mrf.mxu3 }
 0x121   : > { %v686_v5 = vadd.f32 %v685_v4, %v1611_v48  ;;  %v424_v7 = vpop.f32.mrf.mxu0  ;;  %v735_v8 = vadd.f32 %v734_v6, %v1614_v56  ;;  %v473_v9 = vpop.f32.mrf.mxu1 }
 0x122   : > { %v425_v16 = vadd.f32 %v424_v7, %v1605_v42  ;;  %v474_v17 = vadd.f32 %v473_v9, %v1607_v43 }
 0x123   : > { %v770_v13 = vmax.f32 %v686_v5, 0.0  ;;  %v771_v15 = vmax.f32 %v735_v8, 0.0 }
 0x124   : > { %v508_v24 = vmax.f32 %v425_v16, 0.0  ;;  %v509_v25 = vmax.f32 %v474_v17, 0.0 }
 0x125   : > { %v793_v14 = vadd.f32 %v770_v13, %v545_v12 }
 0x126   : > { %v546_v30 = vadd.f32 %v509_v25, %v508_v24 }
 0x127   : > { %v809_v19 = vadd.f32 %v793_v14, %v771_v15 }
 0x128   : > { %v688_v20 = vpop.f32.mrf.mxu2  ;;  %v737_v22 = vpop.f32.mrf.mxu3 }
 0x129   : > { %v1199_v21 = vpack.c.bf16 %v809_v19, %v808_v18  ;;  %v426_v23 = vpop.f32.mrf.mxu0  ;;  %v475_v26 = vpop.f32.mrf.mxu1  ;;  %v689_v27 = vadd.f32 %v688_v20, %v1611_v48  ;;  %v738_v32 = vadd.f32 %v737_v22, %v1614_v56 }
 0x12a   : > { %v427_v28 = vadd.f32 %v426_v23, %v1605_v42  ;;  %v476_v29 = vadd.f32 %v475_v26, %v1607_v43 }
 0x12b   : > { %1219 = vst [vmem:[%s1625_s18 + $0x20] sm:$0xff] %v1199_v21   ;;  %v772_v31 = vmax.f32 %v689_v27, 0.0  ;;  %v773_v44 = vmax.f32 %v738_v32, 0.0 }
 0x12c   : > { %v510_v33 = vmax.f32 %v427_v28, 0.0  ;;  %v511_v34 = vmax.f32 %v476_v29, 0.0 }
 0x12d   : > { %v794_v41 = vadd.f32 %v772_v31, %v546_v30 }
 0x12e   : > { %v547_v45 = vadd.f32 %v511_v34, %v510_v33 }
 0x12f   : > { %v810_v52 = vadd.f32 %v794_v41, %v773_v44 }
 0x130   : > { %v690_v35 = vpop.f32.mrf.mxu2  ;;  %v739_v37 = vpop.f32.mrf.mxu3 }
 0x131   : > { %v691_v36 = vadd.f32 %v690_v35, %v1611_v48  ;;  %v429_v38 = vpop.f32.mrf.mxu0  ;;  %v740_v39 = vadd.f32 %v739_v37, %v1614_v56  ;;  %v478_v40 = vpop.f32.mrf.mxu1 }
 0x132   : > { %v430_v50 = vadd.f32 %v429_v38, %v1605_v42  ;;  %v479_v51 = vadd.f32 %v478_v40, %v1607_v43 }
 0x133   : > { %v774_v46 = vmax.f32 %v691_v36, 0.0  ;;  %v775_v49 = vmax.f32 %v740_v39, 0.0 }
 0x134   : > { %v512_v59 = vmax.f32 %v430_v50, 0.0  ;;  %v513_v60 = vmax.f32 %v479_v51, 0.0 }
 0x135   : > { %v795_v47 = vadd.f32 %v774_v46, %v547_v45 }
 0x136   : > { %v548_v1 = vadd.f32 %v513_v60, %v512_v59 }
 0x137   : > { %v811_v53 = vadd.f32 %v795_v47, %v775_v49 }
 0x138   : > { %v693_v54 = vpop.f32.mrf.mxu2  ;;  %v742_v57 = vpop.f32.mrf.mxu3 }
 0x139   : > { %v1204_v55 = vpack.c.bf16 %v811_v53, %v810_v52  ;;  %v431_v58 = vpop.f32.mrf.mxu0  ;;  %v480_v61 = vpop.f32.mrf.mxu1  ;;  %v694_v62 = vadd.f32 %v693_v54, %v1611_v48  ;;  %v743_v3 = vadd.f32 %v742_v57, %v1614_v56 }
 0x13a   : > { %v432_v63 = vadd.f32 %v431_v58, %v1605_v42  ;;  %v481_v0 = vadd.f32 %v480_v61, %v1607_v43 }
 0x13b   : > { %1220 = vst [vmem:[%s1625_s18 + $0x28] sm:$0xff] %v1204_v55   ;;  %v776_v2 = vmax.f32 %v694_v62, 0.0  ;;  %v777_v13 = vmax.f32 %v743_v3, 0.0 }
 0x13c   : > { %v514_v4 = vmax.f32 %v432_v63, 0.0  ;;  %v515_v5 = vmax.f32 %v481_v0, 0.0 }
 0x13d   : > { %v796_v12 = vadd.f32 %v776_v2, %v548_v1 }
 0x13e   : > { %v549_v14 = vadd.f32 %v515_v5, %v514_v4 }
 0x13f   : > { %v812_v20 = vadd.f32 %v796_v12, %v777_v13 }
 0x140   : > { %v695_v6 = vpop.f32.mrf.mxu2  ;;  %v744_v8 = vpop.f32.mrf.mxu3 }
 0x141   : > { %v696_v7 = vadd.f32 %v695_v6, %v1611_v48  ;;  %v434_v9 = vpop.f32.mrf.mxu0  ;;  %v745_v10 = vadd.f32 %v744_v8, %v1614_v56  ;;  %v483_v11 = vpop.f32.mrf.mxu1 }
 0x142   : > { %v435_v18 = vadd.f32 %v434_v9, %v1605_v42  ;;  %v484_v19 = vadd.f32 %v483_v11, %v1607_v43 }
 0x143   : > { %v778_v15 = vmax.f32 %v696_v7, 0.0  ;;  %v779_v17 = vmax.f32 %v745_v10, 0.0 }
 0x144   : > { %v516_v26 = vmax.f32 %v435_v18, 0.0  ;;  %v517_v27 = vmax.f32 %v484_v19, 0.0 }
 0x145   : > { %v797_v16 = vadd.f32 %v778_v15, %v549_v14 }
 0x146   : > { %v550_v32 = vadd.f32 %v517_v27, %v516_v26 }
 0x147   : > { %v813_v21 = vadd.f32 %v797_v16, %v779_v17 }
 0x148   : > { %v698_v22 = vpop.f32.mrf.mxu2  ;;  %v747_v24 = vpop.f32.mrf.mxu3 }
 0x149   : > { %v1209_v23 = vpack.c.bf16 %v813_v21, %v812_v20  ;;  %v436_v25 = vpop.f32.mrf.mxu0  ;;  %v485_v28 = vpop.f32.mrf.mxu1  ;;  %v699_v29 = vadd.f32 %v698_v22, %v1611_v48  ;;  %v748_v34 = vadd.f32 %v747_v24, %v1614_v56 }
 0x14a   : > { %v437_v30 = vadd.f32 %v436_v25, %v1605_v42  ;;  %v486_v31 = vadd.f32 %v485_v28, %v1607_v43 }
 0x14b   : > { %1221 = vst [vmem:[%s1625_s18 + $0x30] sm:$0xff] %v1209_v23   ;;  %v780_v33 = vmax.f32 %v699_v29, 0.0  ;;  %v781_v43 = vmax.f32 %v748_v34, 0.0 }
 0x14c   : > { %v518_v35 = vmax.f32 %v437_v30, 0.0  ;;  %v519_v36 = vmax.f32 %v486_v31, 0.0 }
 0x14d   : > { %v798_v42 = vadd.f32 %v780_v33, %v550_v32 }
 0x14e   : > { %v551_v41 = vadd.f32 %v519_v36, %v518_v35 }
 0x14f   : > { %v814_v47 = vadd.f32 %v798_v42, %v781_v43 }
 0x150   : > { %v700_v37 = vpop.f32.mrf.mxu2  ;;  %v749_v39 = vpop.f32.mrf.mxu3 }
 0x151   : > { %v701_v38 = vadd.f32 %v700_v37, %v1611_v48  ;;  %v750_v40 = vadd.f32 %v749_v39, %v1614_v56 }
 0x153   : > { %v782_v44 = vmax.f32 %v701_v38, 0.0  ;;  %v783_v46 = vmax.f32 %v750_v40, 0.0 }
 0x155   : > { %v799_v45 = vadd.f32 %v782_v44, %v551_v41 }
 0x157   : > { %v815_v48 = vadd.f32 %v799_v45, %v783_v46 }
 0x159   : > { %v1214_v49 = vpack.c.bf16 %v815_v48, %v814_v47 }
 0x15b   : > { %1222 = vst [vmem:[%s1625_s18 + $0x38] sm:$0xff] %v1214_v49  }
 0x15c   : > { %1413 = shalt.err (!%p1410_p10)
}
 0x15d   : > { %s1464_s22 = smov 64   ;;  %s1465_s24 = smov 4  }
 0x15e   : > { %1233 = dma.vmem_to_hbm [thread:$0]  (%p1551_p0), %s862_s16, 1024, %s864_s29, %s849_s4, %s1464_s22, %s1464_s22, %s1465_s24  }
 0x15f PF: > { %p1255_p11 = scmp.ge.s32.totalorder %s1456_s15, 2  ;;  %s878_s25 = sand.u32 1, %s1444_s12  }
 0x160   : > { %s879_s30 = scalar_lea.sflag [#allocation4], %s878_s25 }
 0x161   : > { %p1247_p12 = pnand %p1255_p11, %p1521_p6 }
 0x163   : > { %p1248_p13 = pneg %p1247_p12 }
 0x165   : > { %1439 = dma.done.wait (%p1248_p13), %s879_s30, 1024  }
 0x166   : > { %1441 = vsyncadd (%p1248_p13), %s879_s30, 4294966272  ;;  %p17_p3 = scmp.ge.s32.totalorder %s1541_s6, 6   ;;  %s1731_s12 = smov %s1448_s13 }
 0x167   : > { %s1732_s13 = smov %s1452_s14  ;;  %s1733_s14 = smov %s1557_s10 }
 0x168   : > { %s1734_s15 = smov %s1541_s6  ;;  %19 = sbr.rel (!%p17_p3) target bundleno = 6 (0x6), region = 85 }
 0x16d   :  { %885 = vsyncpa [#allocation3], 1 }
 0x16e   :  { %887 = vsyncpa [#allocation3 + $0x1], 1 }
 0x16f   :  { %888 = vsyncpa [#allocation6], 1 }
 0x170   :  { %889 = vsyncpa [#allocation4], 1 }
 0x171   :  { %891 = vsyncpa [#allocation4 + $0x1], 1 }

</bundles_post_ra>
